<compile_context>
chip_gen: v5e
topology: v5e:2x2
jax: 0.10.0
libtpu: 0.0.40
codegen_flags: <defaults>
</compile_context>

<pallas_src>
import functools
import math

import jax
import jax.numpy as jnp
from jax import lax
from jax.experimental import pallas as pl
from jax.experimental.pallas import tpu as pltpu

_EPS = 1e-12  # matches torch.nn.functional.normalize default eps


def _round_up(x, n):
    return ((x + n - 1) // n) * n


# --------------------------------------------------------------------------
# Kernels. Inputs are already normalized (and pre-scaled by s on the margin
# path), so the matmul directly produces (s*)cosine in f32.
# --------------------------------------------------------------------------

def _cosine_kernel_2d(x_ref, w_ref, o_ref):
    o_ref[...] = lax.dot_general(
        x_ref[...], w_ref[...],
        dimension_numbers=(((1,), (1,)), ((), ())),
        preferred_element_type=jnp.float32,
    )


def _margin_kernel_2d(x_ref, w_ref, tgt_ref, o_ref, *, sm, tn):
    j = pl.program_id(1)
    logits = lax.dot_general(
        x_ref[...], w_ref[...],
        dimension_numbers=(((1,), (1,)), ((), ())),
        preferred_element_type=jnp.float32,
    )
    col = lax.broadcasted_iota(jnp.int32, logits.shape, 1) + j * tn
    one_hot = (col == tgt_ref[...]).astype(jnp.float32)
    o_ref[...] = logits - sm * one_hot


def _cosine_kernel_3d(x_ref, w_ref, o_ref, *, nk):
    del nk  # reduction finishes when the last partial is accumulated
    k = pl.program_id(2)
    partial = lax.dot_general(
        x_ref[...], w_ref[...],
        dimension_numbers=(((1,), (1,)), ((), ())),
        preferred_element_type=jnp.float32,
    )

    @pl.when(k == 0)
    def _():
        o_ref[...] = partial

    @pl.when(k > 0)
    def _():
        o_ref[...] = o_ref[...] + partial


def _margin_kernel_3d(x_ref, w_ref, tgt_ref, o_ref, *, sm, tn, nk):
    # program ids are read at the top level (NOT inside pl.when) so the
    # interpret/CPU fallback can resolve them.
    j = pl.program_id(1)
    k = pl.program_id(2)
    partial = lax.dot_general(
        x_ref[...], w_ref[...],
        dimension_numbers=(((1,), (1,)), ((), ())),
        preferred_element_type=jnp.float32,
    )

    @pl.when(k == 0)
    def _():
        o_ref[...] = partial

    @pl.when(k > 0)
    def _():
        o_ref[...] = o_ref[...] + partial

    @pl.when(k == nk - 1)
    def _():
        col = lax.broadcasted_iota(jnp.int32, o_ref.shape, 1) + j * tn
        one_hot = (col == tgt_ref[...]).astype(jnp.float32)
        o_ref[...] = o_ref[...] - sm * one_hot


# --------------------------------------------------------------------------
# Wrapper
# --------------------------------------------------------------------------

def cosface_forward(x, weight, target=None, *, s=64.0, m=0.35,
                    block_b=512, block_c=1024, block_f=1024,
                    mxu_dtype=jnp.bfloat16):
    """CosFace forward.

    x: (B, F) float, weight: (C, F) float, target: (B,) int or None.
    Returns (B, C) float32 logits (or un-scaled cosine when target is None).
    """
    B, F = x.shape
    C, F2 = weight.shape
    assert F == F2, "in_features mismatch between input and weight"

    x = x.astype(jnp.float32)
    weight = weight.astype(jnp.float32)

    # Inverse L2 row norms with torch semantics: v / max(||v||, eps).
    inv_x = 1.0 / jnp.maximum(
        jnp.sqrt(jnp.sum(x * x, axis=1, keepdims=True)), _EPS)           # (B, 1)
    inv_w = 1.0 / jnp.maximum(
        jnp.sqrt(jnp.sum(weight * weight, axis=1, keepdims=True)), _EPS)  # (C, 1)

    # Fold normalization (and s on the margin path) into the inputs; fused by
    # XLA with the pad + cast below into a single pass over each operand.
    x_scale = inv_x * (float(s) if target is not None else 1.0)

    itemsize = jnp.dtype(mxu_dtype).itemsize

    # Tile sizes: batch multiple of 16, class/feature multiples of 128.
    bp16, cp128, fp128 = _round_up(B, 16), _round_up(C, 128), _round_up(F, 128)
    tm = min(_round_up(block_b, 16), bp16)
    tn = min(_round_up(block_c, 128), cp128)
    tk = min(_round_up(block_f, 128), fp128)   # tk == Fp for typical F -> K collapses
    Bp, Cp, Fp = _round_up(B, tm), _round_up(C, tn), _round_up(F, tk)
    gi, gj, gk = Bp // tm, Cp // tn, Fp // tk

    def _pad2(a, r, c):
        return jnp.pad(a, ((0, r), (0, c))) if (r or c) else a

    xp = _pad2(x * x_scale, Bp - B, Fp - F).astype(mxu_dtype)
    wp = _pad2(weight * inv_w, Cp - C, Fp - F).astype(mxu_dtype)

    if gk == 1:
        grid = (gi, gj)
        x_spec = pl.BlockSpec((tm, tk), lambda i, j: (i, 0))
        w_spec = pl.BlockSpec((tn, tk), lambda i, j: (j, 0))
        tgt_spec = pl.BlockSpec((tm, 1), lambda i, j: (i, 0))
        out_spec = pl.BlockSpec((tm, tn), lambda i, j: (i, j))
        dim_sem = ("parallel", "parallel")
        x_bytes = Bp * Fp * itemsize                 # resident across the class sweep
    else:
        grid = (gi, gj, gk)
        x_spec = pl.BlockSpec((tm, tk), lambda i, j, k: (i, k))
        w_spec = pl.BlockSpec((tn, tk), lambda i, j, k: (j, k))
        tgt_spec = pl.BlockSpec((tm, 1), lambda i, j, k: (i, 0))
        out_spec = pl.BlockSpec((tm, tn), lambda i, j, k: (i, j))
        dim_sem = ("parallel", "parallel", "arbitrary")
        x_bytes = gj * Bp * Fp * itemsize            # x re-streamed per class tile

    cost = pl.CostEstimate(
        flops=2 * Bp * Cp * Fp,
        transcendentals=0,
        bytes_accessed=(x_bytes + gi * Cp * Fp * itemsize + Bp * Cp * 4
                        + (Bp * 4 if target is not None else 0)),
    )

    # Derive the VMEM limit from double-buffered tiles; cap at 64 MiB (v7x).
    vmem_need = 2 * (tm * tk + tn * tk) * itemsize + 2 * tm * tn * 4 + 2 * tm * 4
    vmem_limit = int(min(max(2 * vmem_need, 32 * 1024 * 1024), 64 * 1024 * 1024))
    compiler_params = pltpu.CompilerParams(
        dimension_semantics=dim_sem,
        vmem_limit_bytes=vmem_limit,
    )
    out_shape = jax.ShapeDtypeStruct((Bp, Cp), jnp.float32)

    if target is None:
        kernel = (_cosine_kernel_2d if gk == 1
                  else functools.partial(_cosine_kernel_3d, nk=gk))
        grid_spec = pltpu.PrefetchScalarGridSpec(
            num_scalar_prefetch=0, grid=grid,
            in_specs=[x_spec, w_spec], out_specs=out_spec)
        out = pl.pallas_call(
            kernel, out_shape=out_shape, grid_spec=grid_spec,
            compiler_params=compiler_params, cost_estimate=cost,
        )(xp, wp)
    else:
        tgt = target.reshape(B, 1).astype(jnp.int32)
        tgt_p = (jnp.pad(tgt, ((0, Bp - B), (0, 0)), constant_values=-1)
                 if Bp > B else tgt)
        sm = float(s) * float(m)
        kernel = (functools.partial(_margin_kernel_2d, sm=sm, tn=tn) if gk == 1
                  else functools.partial(_margin_kernel_3d, sm=sm, tn=tn, nk=gk))
        grid_spec = pltpu.PrefetchScalarGridSpec(
            num_scalar_prefetch=0, grid=grid,
            in_specs=[x_spec, w_spec, tgt_spec], out_specs=out_spec)
        out = pl.pallas_call(
            kernel, out_shape=out_shape, grid_spec=grid_spec,
            compiler_params=compiler_params, cost_estimate=cost,
        )(xp, wp, tgt_p)

    if Bp > B or Cp > C:
        out = out[:B, :C]
    return out


def xavier_uniform(key, out_features, in_features):
    """Deterministic nn.init.xavier_uniform_ equivalent for a (out, in) weight."""
    bound = math.sqrt(6.0 / (in_features + out_features))
    return jax.random.uniform(
        key, (out_features, in_features), dtype=jnp.float32,
        minval=-bound, maxval=bound,
    )


def _reference(x, w, target, s, m):
    xn = x / jnp.maximum(jnp.linalg.norm(x, axis=1, keepdims=True), _EPS)
    wn = w / jnp.maximum(jnp.linalg.norm(w, axis=1, keepdims=True), _EPS)
    cosine = xn @ wn.T
    if target is None:
        return cosine
    one_hot = jax.nn.one_hot(target, w.shape[0], dtype=cosine.dtype)
    return s * (one_hot * (cosine - m) + (1.0 - one_hot) * cosine)


if __name__ == "__main__":
    S, M = 64.0, 0.35
    key = jax.random.PRNGKey(0)
    k_x, k_w, k_t = jax.random.split(key, 3)

    # Small shapes that still exercise padding, batch/class tiling and the
    # K-split accumulation path.
    B, IN_FEATURES, OUT_FEATURES = 40, 200, 300
    x = jax.random.normal(k_x, (B, IN_FEATURES), dtype=jnp.float32)
    weight = xavier_uniform(k_w, OUT_FEATURES, IN_FEATURES)
    target = jax.random.randint(k_t, (B,), 0, OUT_FEATURES, dtype=jnp.int32)

    ref_logits = _reference(x, weight, target, S, M)
    ref_cosine = _reference(x, weight, None, S, M)

    # 1) Default tiles: whole problem in one block, bf16 MXU path.
    logits_default = cosface_forward(x, weight, target, s=S, m=M)
    jax.block_until_ready(logits_default)
    assert jnp.allclose(logits_default, ref_logits, atol=1.0, rtol=0.0), \
        "default-tile bf16 logits mismatch"

    # 2) Small tiles, K collapsed (2-D grid, batch/class tiling + edge padding).
    small = dict(block_b=16, block_c=128, block_f=256)
    logits_bf16 = cosface_forward(x, weight, target, s=S, m=M, **small)
    cosine_bf16 = cosface_forward(x, weight, None, s=S, m=M, **small)
    logits_f32 = cosface_forward(x, weight, target, s=S, m=M,
                                 mxu_dtype=jnp.float32, **small)
    cosine_f32 = cosface_forward(x, weight, None, s=S, m=M,
                                 mxu_dtype=jnp.float32, **small)
    jax.block_until_ready((logits_bf16, cosine_bf16, logits_f32, cosine_f32))

    assert jnp.allclose(logits_f32, ref_logits, atol=5e-3, rtol=1e-4), "f32 logits mismatch"
    assert jnp.allclose(cosine_f32, ref_cosine, atol=1e-4, rtol=1e-4), "f32 cosine mismatch"
    assert jnp.allclose(logits_bf16, ref_logits, atol=1.0, rtol=0.0), "bf16 logits mismatch"
    assert jnp.allclose(cosine_bf16, ref_cosine, atol=2e-2, rtol=0.0), "bf16 cosine mismatch"

    # 3) Forced K split (3-D grid, accumulation directly into the output block).
    multik = dict(block_b=16, block_c=128, block_f=128)
    logits_mk = cosface_forward(x, weight, target, s=S, m=M,
                                mxu_dtype=jnp.float32, **multik)
    cosine_mk = cosface_forward(x, weight, None, s=S, m=M,
                                mxu_dtype=jnp.float32, **multik)
    jax.block_until_ready((logits_mk, cosine_mk))
    assert jnp.allclose(logits_mk, ref_logits, atol=5e-3, rtol=1e-4), "multi-K logits mismatch"
    assert jnp.allclose(cosine_mk, ref_cosine, atol=1e-4, rtol=1e-4), "multi-K cosine mismatch"

    print("KERNEL_OK")
</pallas_src>

<mosaic_0001>
module attributes {stable_mosaic.version = 11 : i64} {
  func.func @_margin_kernel_2d(%arg0: i32, %arg1: i32, %arg2: memref<48x256xbf16, #tpu.memory_space<vmem>>, %arg3: memref<384x256xbf16, #tpu.memory_space<vmem>>, %arg4: memref<48x1xi32, #tpu.memory_space<vmem>>, %arg5: memref<48x384xf32, #tpu.memory_space<vmem>>) attributes {dimension_semantics = [#tpu.dimension_semantics<parallel>, #tpu.dimension_semantics<parallel>], iteration_bounds = array<i64: 1, 1>, scalar_prefetch = 0 : i64, scratch_operands = 0 : i64, tpu.core_type = #tpu.core_type<tc>, window_params = [{transform_indices = @transform_0, window_bounds = array<i64: 48, 256>}, {transform_indices = @transform_1, window_bounds = array<i64: 384, 256>}, {transform_indices = @transform_2, window_bounds = array<i64: 48, 1>}, {transform_indices = @transform_3, window_bounds = array<i64: 48, 384>}]} {
    %c0 = arith.constant 0 : index
    %c0_0 = arith.constant 0 : index
    %0 = vector.load %arg2[%c0, %c0_0] : memref<48x256xbf16, #tpu.memory_space<vmem>>, vector<48x256xbf16>
    %c0_1 = arith.constant 0 : index
    %c0_2 = arith.constant 0 : index
    %1 = vector.load %arg3[%c0_1, %c0_2] : memref<384x256xbf16, #tpu.memory_space<vmem>>, vector<384x256xbf16>
    %cst = arith.constant dense<0.000000e+00> : vector<48x384xf32>
    %2 = tpu.matmul %0, %1, %cst {dimension_numbers = #tpu.dot_dimension_numbers<[1], [1], [0], [0], [0, 0, 1, 0], [], []>} : vector<48x256xbf16>, vector<384x256xbf16>, vector<48x384xf32> -> vector<48x384xf32>
    %3 = tpu.iota {dimensions = array<i32: 1>} : vector<48x384xi32>
    %c384_i32 = arith.constant 384 : i32
    %4 = arith.muli %arg1, %c384_i32 : i32
    %5 = vector.broadcast %4 : i32 to vector<48x384xi32>
    %6 = arith.addi %3, %5 : vector<48x384xi32>
    %c0_3 = arith.constant 0 : index
    %c0_4 = arith.constant 0 : index
    %7 = vector.load %arg4[%c0_3, %c0_4] : memref<48x1xi32, #tpu.memory_space<vmem>>, vector<48x1xi32>
    %8 = vector.broadcast %7 : vector<48x1xi32> to vector<48x384xi32>
    %9 = arith.cmpi eq, %6, %8 : vector<48x384xi32>
    %10 = arith.extui %9 : vector<48x384xi1> to vector<48x384xi32>
    %11 = arith.sitofp %10 : vector<48x384xi32> to vector<48x384xf32>
    %cst_5 = arith.constant 2.240000e+01 : f32
    %12 = vector.broadcast %cst_5 : f32 to vector<48x384xf32>
    %13 = arith.mulf %12, %11 : vector<48x384xf32>
    %14 = arith.subf %2, %13 : vector<48x384xf32>
    %c0_6 = arith.constant 0 : index
    %c0_7 = arith.constant 0 : index
    %15 = vector.load %arg5[%c0_6, %c0_7] : memref<48x384xf32, #tpu.memory_space<vmem>>, vector<48x384xf32>
    tpu.vector_store %arg5[%c0_6, %c0_7], %14 {strides = array<i32>} : memref<48x384xf32, #tpu.memory_space<vmem>>, vector<48x384xf32>,
    return
  }
  func.func @transform_0(%arg0: i32, %arg1: i32) -> (i32, i32) {
    %c0_i32 = arith.constant 0 : i32
    %c0_i32_0 = arith.constant 0 : i32
    return %arg0, %c0_i32 : i32, i32
  }
  func.func @transform_1(%arg0: i32, %arg1: i32) -> (i32, i32) {
    %c0_i32 = arith.constant 0 : i32
    %c0_i32_0 = arith.constant 0 : i32
    return %arg1, %c0_i32 : i32, i32
  }
  func.func @transform_2(%arg0: i32, %arg1: i32) -> (i32, i32) {
    %c0_i32 = arith.constant 0 : i32
    %c0_i32_0 = arith.constant 0 : i32
    return %arg0, %c0_i32 : i32, i32
  }
  func.func @transform_3(%arg0: i32, %arg1: i32) -> (i32, i32) {
    %c0_i32 = arith.constant 0 : i32
    return %arg0, %arg1 : i32, i32
  }
}

</mosaic_0001>

<bundles_post_ra>
// kernel: tpu_custom_call.1
= control target key start
LH: loop header
LB: loop body
LE: loop exit
PB: predicated region body
PF: predicated region fallthrough
CT: control target
= control target key end

     0   :  { %8 = vsyncpa [#allocation3], 0  ;;  %s1200_s0 = inlined_call_operand.vmem [shape: bf16[48,256], index: 0, kind: input, shape index: {}]   ;;  %s1201_s1 = inlined_call_operand.hbm [shape: bf16[384,256], index: 1, kind: input, shape index: {}]   ;;  %s1202_s2 = inlined_call_operand.vmem [shape: s32[48,1], index: 2, kind: input, shape index: {}]   ;;  %s1203_s3 = inlined_call_operand.hbm [shape: f32[48,384], index: 3, kind: output, shape index: {}]  }
   0x1   :  { %9 = vsyncpa [#allocation4], 0  ;;  %s16_s14 = sshll.u32 %s1201_s1, 4  ;;  %s1026_s15 = smov [#allocation2]   ;;  %s17_s14 = int_to_ptr.hbm [resolvable:$true] %s16_s14 }
   0x2   :  { %s18_s16 = sshll.u32 %s1026_s15, 4  ;;  %s1027_s17 = smov 128   ;;  %s19_s16 = int_to_ptr.vmem [resolvable:$true] %s18_s16 }
   0x3   :  { %s1028_s18 = smov 8  }
   0x4   :  { %24 = dma.hbm_to_vmem [thread:$0]  %s17_s14, 6144, %s19_s16, [#allocation3], %s1027_s17, %s1027_s17, %s1028_s18  }
   0x5   :  { %1022 = dma.done.wait [#allocation3], 6144  }
   0x6   :  { %1023 = vsyncadd [#allocation3], 4294961152  ;;  %v805_v0 = vld [vmem:[#allocation2 + $0xf0] sm:$0xf]  ;;  %v930_v1 = vld [vmem:[#allocation2 + $0xf4] sm:$0xf0] }
   0x7   :  { %v929_v2 = vld [vmem:[#allocation2 + $0xf4] sm:$0xf]  ;;  %v806_v3 = vor.u32 %v930_v1, %v805_v0  ;;  %v807_v4 = vld [vmem:[#allocation2 + $0xf8] sm:$0xf0]  ;;  %v741_v6 = vld [vmem:[#allocation2 + $0x70] sm:$0xf] }
   0x8   :  { %v810_v5 = vor.u32 %v929_v2, %v807_v4  ;;  %v914_v7 = vld [vmem:[#allocation2 + $0x74] sm:$0xf0]  ;;  %v913_v8 = vld [vmem:[#allocation2 + $0x74] sm:$0xf]  ;;  %v743_v9 = vld [vmem:[#allocation2 + $0x78] sm:$0xf0] }
   0x9   :  { %403 = vmatpush.bf16.xpose.msra.mxu2 %v806_v3  ;;  %v797_v10 = vld [vmem:[#allocation2 + $0xe0] sm:$0xf]  ;;  %v928_v11 = vld [vmem:[#allocation2 + $0xe4] sm:$0xf0]  ;;  %v742_v12 = vor.u32 %v914_v7, %v741_v6  ;;  %v746_v13 = vor.u32 %v913_v8, %v743_v9  ;;  %v927_v14 = vld [vmem:[#allocation2 + $0xe4] sm:$0xf] }
   0xa   :  { %427 = vmatpush.bf16.xpose.msra.mxu3 %v810_v5  ;;  %v799_v15 = vld [vmem:[#allocation2 + $0xe8] sm:$0xf0]  ;;  %v733_v16 = vld [vmem:[#allocation2 + $0x60] sm:$0xf]  ;;  %v798_v17 = vor.u32 %v928_v11, %v797_v10  ;;  %v912_v18 = vld [vmem:[#allocation2 + $0x64] sm:$0xf0] }
   0xb   :  { %355 = vmatpush.bf16.xpose.msra.mxu0 %v742_v12  ;;  %379 = vmatpush.bf16.xpose.msra.mxu1 %v746_v13  ;;  %v911_v19 = vld [vmem:[#allocation2 + $0x64] sm:$0xf]  ;;  %v735_v20 = vld [vmem:[#allocation2 + $0x68] sm:$0xf0]  ;;  %v802_v21 = vor.u32 %v927_v14, %v799_v15  ;;  %v734_v22 = vor.u32 %v912_v18, %v733_v16  ;;  %v789_v24 = vld [vmem:[#allocation2 + $0xd0] sm:$0xf] }
   0xc   :  { %v738_v23 = vor.u32 %v911_v19, %v735_v20  ;;  %v926_v25 = vld [vmem:[#allocation2 + $0xd4] sm:$0xf0]  ;;  %v925_v26 = vld [vmem:[#allocation2 + $0xd4] sm:$0xf]  ;;  %v791_v27 = vld [vmem:[#allocation2 + $0xd8] sm:$0xf0] }
   0xd   :  { %v725_v28 = vld [vmem:[#allocation2 + $0x50] sm:$0xf]  ;;  %v790_v29 = vor.u32 %v926_v25, %v789_v24  ;;  %v910_v30 = vld [vmem:[#allocation2 + $0x54] sm:$0xf0]  ;;  %v909_v31 = vld [vmem:[#allocation2 + $0x54] sm:$0xf]  ;;  %v794_v33 = vor.u32 %v925_v26, %v791_v27 }
   0xe   :  { %v727_v32 = vld [vmem:[#allocation2 + $0x58] sm:$0xf0]  ;;  %v726_v34 = vor.u32 %v910_v30, %v725_v28  ;;  %v781_v36 = vld [vmem:[#allocation2 + $0xc0] sm:$0xf]  ;;  %v924_v37 = vld [vmem:[#allocation2 + $0xc4] sm:$0xf0] }
   0xf   :  { %v730_v35 = vor.u32 %v909_v31, %v727_v32  ;;  %v923_v38 = vld [vmem:[#allocation2 + $0xc4] sm:$0xf]  ;;  %v783_v39 = vld [vmem:[#allocation2 + $0xc8] sm:$0xf0]  ;;  %v717_v40 = vld [vmem:[#allocation2 + $0x40] sm:$0xf]  ;;  %v782_v41 = vor.u32 %v924_v37, %v781_v36 }
  0x10   :  { %v908_v42 = vld [vmem:[#allocation2 + $0x44] sm:$0xf0]  ;;  %v907_v43 = vld [vmem:[#allocation2 + $0x44] sm:$0xf]  ;;  %v719_v44 = vld [vmem:[#allocation2 + $0x48] sm:$0xf0]  ;;  %v786_v45 = vor.u32 %v923_v38, %v783_v39 }
  0x11   :  { %404 = vmatpush.bf16.xpose.msra.mxu2 %v798_v17  ;;  %v718_v46 = vor.u32 %v908_v42, %v717_v40  ;;  %v722_v47 = vor.u32 %v907_v43, %v719_v44  ;;  %v773_v48 = vld [vmem:[#allocation2 + $0xb0] sm:$0xf]  ;;  %v922_v49 = vld [vmem:[#allocation2 + $0xb4] sm:$0xf0]  ;;  %v921_v50 = vld [vmem:[#allocation2 + $0xb4] sm:$0xf] }
  0x12   :  { %428 = vmatpush.bf16.xpose.msra.mxu3 %v802_v21  ;;  %v775_v51 = vld [vmem:[#allocation2 + $0xb8] sm:$0xf0]  ;;  %v709_v52 = vld [vmem:[#allocation2 + $0x30] sm:$0xf]  ;;  %v774_v53 = vor.u32 %v922_v49, %v773_v48  ;;  %v906_v54 = vld [vmem:[#allocation2 + $0x34] sm:$0xf0] }
  0x13   :  { %356 = vmatpush.bf16.xpose.msra.mxu0 %v734_v22  ;;  %380 = vmatpush.bf16.xpose.msra.mxu1 %v738_v23  ;;  %v905_v55 = vld [vmem:[#allocation2 + $0x34] sm:$0xf]  ;;  %v711_v56 = vld [vmem:[#allocation2 + $0x38] sm:$0xf0]  ;;  %v778_v57 = vor.u32 %v921_v50, %v775_v51  ;;  %v710_v58 = vor.u32 %v906_v54, %v709_v52  ;;  %v765_v60 = vld [vmem:[#allocation2 + $0xa0] sm:$0xf] }
  0x14   :  { %v714_v59 = vor.u32 %v905_v55, %v711_v56  ;;  %v920_v61 = vld [vmem:[#allocation2 + $0xa4] sm:$0xf0]  ;;  %v919_v62 = vld [vmem:[#allocation2 + $0xa4] sm:$0xf]  ;;  %v767_v63 = vld [vmem:[#allocation2 + $0xa8] sm:$0xf0] }
  0x15   :  { %v701_v0 = vld [vmem:[#allocation2 + $0x20] sm:$0xf]  ;;  %v766_v1 = vor.u32 %v920_v61, %v765_v60  ;;  %v904_v2 = vld [vmem:[#allocation2 + $0x24] sm:$0xf0]  ;;  %v903_v3 = vld [vmem:[#allocation2 + $0x24] sm:$0xf]  ;;  %v770_v5 = vor.u32 %v919_v62, %v767_v63 }
  0x16   :  { %v703_v4 = vld [vmem:[#allocation2 + $0x28] sm:$0xf0]  ;;  %v702_v6 = vor.u32 %v904_v2, %v701_v0  ;;  %v757_v8 = vld [vmem:[#allocation2 + $0x90] sm:$0xf]  ;;  %v918_v9 = vld [vmem:[#allocation2 + $0x94] sm:$0xf0] }
  0x17   :  { %v706_v7 = vor.u32 %v903_v3, %v703_v4  ;;  %v917_v10 = vld [vmem:[#allocation2 + $0x94] sm:$0xf]  ;;  %v759_v11 = vld [vmem:[#allocation2 + $0x98] sm:$0xf0]  ;;  %v508_v12 = vld [vmem:[%s1202_s2] sm:$0xff]  ;;  %v758_v14 = vor.u32 %v918_v9, %v757_v8  ;;  %v1029_v18 = vmov 0  }
  0x18   :  { %v693_v13 = vld [vmem:[#allocation2 + $0x10] sm:$0xf]  ;;  %v902_v15 = vld [vmem:[#allocation2 + $0x14] sm:$0xf0]  ;;  %v901_v16 = vld [vmem:[#allocation2 + $0x14] sm:$0xf]  ;;  %971 = vset.pattern.permute.xlu0 %v1029_v18  ;;  %972 = vset.pattern.permute.xlu1 %v1029_v18  ;;  %v762_v19 = vor.u32 %v917_v10, %v759_v11 }
  0x19   :  { %405 = vmatpush.bf16.xpose.msra.mxu2 %v790_v29  ;;  %v695_v17 = vld [vmem:[#allocation2 + $0x18] sm:$0xf0]  ;;  %515 = vperm.xlu0 %971, %v508_v12   ;;  %v694_v20 = vor.u32 %v902_v15, %v693_v13  ;;  %v749_v22 = vld [vmem:[#allocation2 + $0x80] sm:$0xf]  ;;  %v916_v23 = vld [vmem:[#allocation2 + $0x84] sm:$0xf0] }
  0x1a   :  { %429 = vmatpush.bf16.xpose.msra.mxu3 %v794_v33  ;;  %973 = vset.pattern.permute.xlu2 %v1029_v18  ;;  %v698_v21 = vor.u32 %v901_v16, %v695_v17  ;;  %v915_v24 = vld [vmem:[#allocation2 + $0x84] sm:$0xf]  ;;  %v751_v25 = vld [vmem:[#allocation2 + $0x88] sm:$0xf0]  ;;  %v869_v26 = vld [vmem:[#allocation2 + $0x170] sm:$0xf]  ;;  %v750_v32 = vor.u32 %v916_v23, %v749_v22 }
  0x1b   :  { %357 = vmatpush.bf16.xpose.msra.mxu0 %v726_v34  ;;  %381 = vmatpush.bf16.xpose.msra.mxu1 %v730_v35  ;;  %v946_v27 = vld [vmem:[#allocation2 + $0x174] sm:$0xf0]  ;;  %v509_v28 = vld [vmem:[%s1202_s2 + $0x8] sm:$0xff]  ;;  %v945_v29 = vld [vmem:[#allocation2 + $0x174] sm:$0xf]  ;;  %v754_v36 = vor.u32 %v915_v24, %v751_v25  ;;  %s646_s28 = sshll.u32 %s1203_s3, 4  ;;  %s647_s28 = int_to_ptr.hbm [resolvable:$true] %s646_s28 }
  0x1c   :  { %v871_v30 = vld [vmem:[#allocation2 + $0x178] sm:$0xf0]  ;;  %v685_v31 = vld [vmem:[#allocation2] sm:$0xf]  ;;  %v900_v33 = vld [vmem:[#allocation2 + $0x4] sm:$0xf0]  ;;  %v870_v37 = vor.u32 %v946_v27, %v869_v26 }
  0x1d   :  { %v899_v34 = vld [vmem:[#allocation2 + $0x4] sm:$0xf]  ;;  %v687_v35 = vld [vmem:[#allocation2 + $0x8] sm:$0xf0]  ;;  %v874_v38 = vor.u32 %v945_v29, %v871_v30  ;;  %v686_v39 = vor.u32 %v900_v33, %v685_v31  ;;  %v894_v42 = vld [vmem:[%s1200_s0 + $0x4] sm:$0xf0] }
  0x1e   :  { %v690_v40 = vor.u32 %v899_v34, %v687_v35  ;;  %v893_v43 = vld [vmem:[%s1200_s0 + $0x4] sm:$0xf]  ;;  %v663_v44 = vld [vmem:[%s1200_s0 + $0x8] sm:$0xf0]  ;;  %v853_v54 = vld [vmem:[#allocation2 + $0x150] sm:$0xf] }
  0x1f   :  { %v943_v49 = vld [vmem:[#allocation2 + $0x164] sm:$0xf]  ;;  %v863_v50 = vld [vmem:[#allocation2 + $0x168] sm:$0xf0]  ;;  %v1080_v51 = vor.u32 %v893_v43, %v663_v44  ;;  %v942_v55 = vld [vmem:[#allocation2 + $0x154] sm:$0xf0] }
  0x20   :  { %v511_v56 = vld [vmem:[%s1202_s2 + $0x18] sm:$0xff]  ;;  %v669_v61 = vld [vmem:[%s1200_s0 + $0x10] sm:$0xf]  ;;  %v895_v63 = vld [vmem:[%s1200_s0 + $0x14] sm:$0xf]  ;;  %s1032_s29 = smov 384  }
  0x21   :  { %406 = vmatpush.bf16.xpose.msra.mxu2 %v782_v41  ;;  %518 = vperm.xlu0 %971, %v509_v28   ;;  %v661_v41 = vld [vmem:[%s1200_s0] sm:$0xf]  ;;  %v896_v62 = vld [vmem:[%s1200_s0 + $0x14] sm:$0xf0]  ;;  %v671_v0 = vld [vmem:[%s1200_s0 + $0x18] sm:$0xf0] }
  0x22   :  { %430 = vmatpush.bf16.xpose.msra.mxu3 %v786_v45  ;;  %v861_v45 = vld [vmem:[#allocation2 + $0x160] sm:$0xf]  ;;  %v1078_v48 = vor.u32 %v894_v42, %v661_v41  ;;  %v940_v2 = vld [vmem:[#allocation2 + $0x144] sm:$0xf0]  ;;  %v1101_v3 = vor.u32 %v896_v62, %v669_v61  ;;  %v939_v4 = vld [vmem:[#allocation2 + $0x144] sm:$0xf]  ;;  %v499_v41 = vlaneseq }
  0x23   :  { %358 = vmatpush.bf16.xpose.msra.mxu0 %v718_v46  ;;  %382 = vmatpush.bf16.xpose.msra.mxu1 %v722_v47  ;;  %v944_v46 = vld [vmem:[#allocation2 + $0x164] sm:$0xf0]  ;;  %v510_v47 = vld [vmem:[%s1202_s2 + $0x10] sm:$0xff]  ;;  %v938_v10 = vld [vmem:[#allocation2 + $0x134] sm:$0xf0]  ;;  %s1033_s30 = smov 24  }
  0x24   :  { %v862_v52 = vor.u32 %v944_v46, %v861_v45  ;;  %521 = vperm.xlu1 %972, %v510_v47   ;;  %v837_v9 = vld [vmem:[#allocation2 + $0x130] sm:$0xf]  ;;  %v937_v11 = vld [vmem:[#allocation2 + $0x134] sm:$0xf]  ;;  %v839_v12 = vld [vmem:[#allocation2 + $0x138] sm:$0xf0] }
  0x25   :  { %v838_v13 = vor.u32 %v938_v10, %v837_v9  ;;  %v677_v15 = vld [vmem:[%s1200_s0 + $0x20] sm:$0xf]  ;;  %v898_v16 = vld [vmem:[%s1200_s0 + $0x24] sm:$0xf0]  ;;  %v897_v17 = vld [vmem:[%s1200_s0 + $0x24] sm:$0xf] }
  0x26   :  { %v679_v18 = vld [vmem:[%s1200_s0 + $0x28] sm:$0xf0]  ;;  %v935_v22 = vld [vmem:[#allocation2 + $0x124] sm:$0xf]  ;;  %v821_v28 = vld [vmem:[#allocation2 + $0x110] sm:$0xf] }
  0x27   :  { %v831_v23 = vld [vmem:[#allocation2 + $0x128] sm:$0xf0]  ;;  %v512_v24 = vld [vmem:[%s1202_s2 + $0x20] sm:$0xff]  ;;  %v682_v25 = vor.u32 %v897_v17, %v679_v18  ;;  %v934_v29 = vld [vmem:[#allocation2 + $0x114] sm:$0xf0]  ;;  %v1131_v42 = vand.u32 127, %v499_v41 }
  0x28   :  { %527 = vperm.xlu2 %973, %v512_v24   ;;  %v834_v27 = vor.u32 %v935_v22, %v831_v23  ;;  %v933_v30 = vld [vmem:[#allocation2 + $0x114] sm:$0xf]  ;;  %v823_v31 = vld [vmem:[#allocation2 + $0x118] sm:$0xf0]  ;;  %v513_v34 = vld [vmem:[%s1202_s2 + $0x28] sm:$0xff]  ;;  %v1030_v45 = vmov 0.0  }
  0x29   :  { %407 = vmatpush.bf16.xpose.msra.mxu2 %v774_v53  ;;  %v866_v53 = vor.u32 %v943_v49, %v863_v50  ;;  %v826_v33 = vor.u32 %v933_v30, %v823_v31  ;;  %v813_v35 = vld [vmem:[#allocation2 + $0x100] sm:$0xf]  ;;  %v1136_v44 = vadd.s32 128, %v1131_v42  ;;  %s1031_s2 = smov [#allocation5]  }
  0x2a   :  { %431 = vmatpush.bf16.xpose.msra.mxu3 %v778_v57  ;;  %v941_v57 = vld [vmem:[#allocation2 + $0x154] sm:$0xf]  ;;  %s644_s25 = sshll.u32 %s1031_s2, 4  ;;  %s645_s25 = int_to_ptr.vmem [resolvable:$true] %s644_s25 }
  0x2b   :  { %359 = vmatpush.bf16.xpose.msra.mxu0 %v710_v58  ;;  %383 = vmatpush.bf16.xpose.msra.mxu1 %v714_v59  ;;  %v855_v58 = vld [vmem:[#allocation2 + $0x158] sm:$0xf0]  ;;  %v854_v59 = vor.u32 %v942_v55, %v853_v54 }
  0x2c   :  { %524 = vperm.xlu1 %972, %v511_v56   ;;  %v858_v60 = vor.u32 %v941_v57, %v855_v58 }
  0x30   :  { %530 = vperm.xlu2 %973, %v513_v34  }
  0x31   :  { %408 = vmatpush.bf16.xpose.msra.mxu2 %v766_v1  ;;  %v845_v1 = vld [vmem:[#allocation2 + $0x140] sm:$0xf] }
  0x32   :  { %432 = vmatpush.bf16.xpose.msra.mxu3 %v770_v5  ;;  %v847_v5 = vld [vmem:[#allocation2 + $0x148] sm:$0xf0] }
  0x33   :  { %360 = vmatpush.bf16.xpose.msra.mxu0 %v702_v6  ;;  %384 = vmatpush.bf16.xpose.msra.mxu1 %v706_v7  ;;  %v1103_v6 = vor.u32 %v895_v63, %v671_v0  ;;  %v846_v7 = vor.u32 %v940_v2, %v845_v1  ;;  %v850_v8 = vor.u32 %v939_v4, %v847_v5 }
  0x39   :  { %409 = vmatpush.bf16.xpose.msra.mxu2 %v758_v14  ;;  %v842_v14 = vor.u32 %v937_v11, %v839_v12 }
  0x3a   :  { %433 = vmatpush.bf16.xpose.msra.mxu3 %v762_v19  ;;  %v829_v19 = vld [vmem:[#allocation2 + $0x120] sm:$0xf] }
  0x3b   :  { %361 = vmatpush.bf16.xpose.msra.mxu0 %v694_v20  ;;  %385 = vmatpush.bf16.xpose.msra.mxu1 %v698_v21  ;;  %v936_v20 = vld [vmem:[#allocation2 + $0x124] sm:$0xf0]  ;;  %v678_v21 = vor.u32 %v898_v16, %v677_v15 }
  0x3c   :  { %v830_v26 = vor.u32 %v936_v20, %v829_v19 }
  0x41   :  { %410 = vmatpush.bf16.xpose.msra.mxu2 %v750_v32  ;;  %v822_v32 = vor.u32 %v934_v29, %v821_v28 }
  0x42   :  { %434 = vmatpush.bf16.xpose.msra.mxu3 %v754_v36  ;;  %v932_v36 = vld [vmem:[#allocation2 + $0x104] sm:$0xf0] }
  0x43   :  { %362 = vmatpush.bf16.xpose.msra.mxu0 %v686_v39  ;;  %386 = vmatpush.bf16.xpose.msra.mxu1 %v690_v40  ;;  %v814_v39 = vor.u32 %v932_v36, %v813_v35 }
  0x48   :  { %411 = vmatmul.bf16.vlgmr.msra.gmra.mxu2 %v1078_v48 }
  0x49   :  { %947 = vmatpush.bf16.xpose.msrb.mxu2 %v870_v37  ;;  %435 = vmatmul.bf16.vlgmr.msra.gmra.mxu3 %v1080_v51 }
  0x4a   :  { %955 = vmatpush.bf16.xpose.msrb.mxu3 %v874_v38  ;;  %363 = vmatmul.bf16.vlgmr.msra.gmra.mxu0 %v1078_v48 }
  0x4b   :  { %451 = vmatpush.bf16.xpose.msrb.mxu0 %v870_v37  ;;  %475 = vmatpush.bf16.xpose.msrb.mxu1 %v874_v38  ;;  %v931_v37 = vld [vmem:[#allocation2 + $0x104] sm:$0xf]  ;;  %v815_v38 = vld [vmem:[#allocation2 + $0x108] sm:$0xf0] }
  0x4c   :  { %387 = vmatmul.bf16.vlgmr.msra.gmra.mxu1 %v1080_v51  ;;  %v818_v40 = vor.u32 %v931_v37, %v815_v38 }
  0x51   :  { %948 = vmatpush.bf16.xpose.msrb.mxu2 %v862_v52 }
  0x52   :  { %956 = vmatpush.bf16.xpose.msrb.mxu3 %v866_v53 }
  0x53   :  { %452 = vmatpush.bf16.xpose.msrb.mxu0 %v862_v52  ;;  %476 = vmatpush.bf16.xpose.msrb.mxu1 %v866_v53 }
  0x58   :  { %416 = vmatmul.bf16.gmra.mxu2 %v1101_v3 }
  0x59   :  { %949 = vmatpush.bf16.xpose.msrb.mxu2 %v854_v59  ;;  %440 = vmatmul.bf16.gmra.mxu3 %v1103_v6 }
  0x5a   :  { %957 = vmatpush.bf16.xpose.msrb.mxu3 %v858_v60  ;;  %368 = vmatmul.bf16.gmra.mxu0 %v1101_v3 }
  0x5b   :  { %453 = vmatpush.bf16.xpose.msrb.mxu0 %v854_v59  ;;  %477 = vmatpush.bf16.xpose.msrb.mxu1 %v858_v60 }
  0x5c   :  { %392 = vmatmul.bf16.gmra.mxu1 %v1103_v6 }
  0x61   :  { %950 = vmatpush.bf16.xpose.msrb.mxu2 %v846_v7 }
  0x62   :  { %958 = vmatpush.bf16.xpose.msrb.mxu3 %v850_v8 }
  0x63   :  { %454 = vmatpush.bf16.xpose.msrb.mxu0 %v846_v7  ;;  %478 = vmatpush.bf16.xpose.msrb.mxu1 %v850_v8 }
  0x68   :  { %421 = vmatmul.bf16.gmra.mxu2 %v678_v21 }
  0x69   :  { %951 = vmatpush.bf16.xpose.msrb.mxu2 %v838_v13  ;;  %445 = vmatmul.bf16.gmra.mxu3 %v682_v25 }
  0x6a   :  { %959 = vmatpush.bf16.xpose.msrb.mxu3 %v842_v14  ;;  %373 = vmatmul.bf16.gmra.mxu0 %v678_v21 }
  0x6b   :  { %455 = vmatpush.bf16.xpose.msrb.mxu0 %v838_v13  ;;  %479 = vmatpush.bf16.xpose.msrb.mxu1 %v842_v14 }
  0x6c   :  { %397 = vmatmul.bf16.gmra.mxu1 %v682_v25 }
  0x71   :  { %952 = vmatpush.bf16.xpose.msrb.mxu2 %v830_v26 }
  0x72   :  { %960 = vmatpush.bf16.xpose.msrb.mxu3 %v834_v27 }
  0x73   :  { %456 = vmatpush.bf16.xpose.msrb.mxu0 %v830_v26  ;;  %480 = vmatpush.bf16.xpose.msrb.mxu1 %v834_v27 }
  0x79   :  { %953 = vmatpush.bf16.xpose.msrb.mxu2 %v822_v32 }
  0x7a   :  { %961 = vmatpush.bf16.xpose.msrb.mxu3 %v826_v33 }
  0x7b   :  { %457 = vmatpush.bf16.xpose.msrb.mxu0 %v822_v32  ;;  %481 = vmatpush.bf16.xpose.msrb.mxu1 %v826_v33 }
  0x81   :  { %954 = vmatpush.bf16.xpose.msrb.mxu2 %v814_v39 }
  0x82   :  { %962 = vmatpush.bf16.xpose.msrb.mxu3 %v818_v40  ;;  %v1167_v22 = vpop.permute.xlu2 %527 }
  0x83   :  { %458 = vmatpush.bf16.xpose.msrb.mxu0 %v814_v39  ;;  %482 = vmatpush.bf16.xpose.msrb.mxu1 %v818_v40  ;;  %vm544_vm8 = vcmp.eq.s32.totalorder %v1131_v42, %v1167_v22  ;;  %vm545_vm9 = vcmp.eq.s32.totalorder %v1136_v44, %v1167_v22 }
  0x84   :  { %v887_v33 = vsel %vm544_vm8, 1.0, %v1030_v45  ;;  %v888_v35 = vsel %vm545_vm9, 1.0, %v1030_v45 }
  0x85   :  { %v598_v37 = vmul.f32 22.4, %v887_v33 }
  0x88   :  { %464 = vmatmul.bf16.vlgmr.msrb.gmra.mxu2 %v1101_v3 }
  0x89   :  { %488 = vmatmul.bf16.vlgmr.msrb.gmra.mxu3 %v1103_v6 }
  0x8a   :  { %459 = vmatmul.bf16.vlgmr.msrb.gmra.mxu0 %v1078_v48  ;;  %483 = vmatmul.bf16.vlgmr.msrb.gmra.mxu1 %v1080_v51  ;;  %v1176_v38 = vpop.permute.xlu2 %530 }
  0x8b   :  { %v1133_v43 = vpop.permute.xlu0 %515  ;;  %vm547_vm10 = vcmp.eq.s32.totalorder %v1131_v42, %v1176_v38  ;;  %vm548_vm11 = vcmp.eq.s32.totalorder %v1136_v44, %v1176_v38 }
  0x8c   :  { %vm532_vm0 = vcmp.eq.s32.totalorder %v1131_v42, %v1133_v43  ;;  %vm533_vm1 = vcmp.eq.s32.totalorder %v1136_v44, %v1133_v43 }
  0x8d   :  { %v875_v46 = vsel %vm532_vm0, 1.0, %v1030_v45  ;;  %v876_v47 = vsel %vm533_vm1, 1.0, %v1030_v45 }
  0x8e   :  { %v586_v49 = vmul.f32 22.4, %v875_v46  ;;  %v587_v54 = vmul.f32 22.4, %v876_v47  ;;  %v599_v46 = vmul.f32 22.4, %v888_v35 }
  0x93   :  { %v1144_v50 = vpop.permute.xlu0 %518 }
  0x94   :  { %vm535_vm2 = vcmp.eq.s32.totalorder %v1131_v42, %v1144_v50  ;;  %vm536_vm3 = vcmp.eq.s32.totalorder %v1136_v44, %v1144_v50 }
  0x95   :  { %v878_v58 = vsel %vm535_vm2, 1.0, %v1030_v45  ;;  %v879_v61 = vsel %vm536_vm3, 1.0, %v1030_v45 }
  0x96   :  { %v1151_v60 = vpop.permute.xlu1 %521  ;;  %v589_v62 = vmul.f32 22.4, %v878_v58  ;;  %v590_v2 = vmul.f32 22.4, %v879_v61 }
  0x97   :  { %vm538_vm4 = vcmp.eq.s32.totalorder %v1131_v42, %v1151_v60  ;;  %vm539_vm5 = vcmp.eq.s32.totalorder %v1136_v44, %v1151_v60 }
  0x98   :  { %469 = vmatmul.bf16.gmra.mxu2 %v678_v21  ;;  %v881_v7 = vsel %vm538_vm4, 1.0, %v1030_v45  ;;  %v882_v9 = vsel %vm539_vm5, 1.0, %v1030_v45 }
  0x99   :  { %493 = vmatmul.bf16.gmra.mxu3 %v682_v25  ;;  %v592_v11 = vmul.f32 22.4, %v881_v7  ;;  %v593_v16 = vmul.f32 22.4, %v882_v9 }
  0x9e   :  { %v1160_v12 = vpop.permute.xlu1 %524 }
  0x9f   :  { %vm541_vm6 = vcmp.eq.s32.totalorder %v1131_v42, %v1160_v12  ;;  %vm542_vm7 = vcmp.eq.s32.totalorder %v1136_v44, %v1160_v12  ;;  %v502_v44 = vadd.s32 256, %v1131_v42 }
  0xa0   :  { %v884_v20 = vsel %vm541_vm6, 1.0, %v1030_v45  ;;  %v885_v23 = vsel %vm542_vm7, 1.0, %v1030_v45 }
  0xa1   :  { %v595_v24 = vmul.f32 22.4, %v884_v20  ;;  %v596_v28 = vmul.f32 22.4, %v885_v23  ;;  %vm534_vm12 = vcmp.eq.s32.totalorder %v502_v44, %v1133_v43  ;;  %vm540_vm13 = vcmp.eq.s32.totalorder %v502_v44, %v1151_v60 }
  0xa2   :  { %vm537_vm14 = vcmp.eq.s32.totalorder %v502_v44, %v1144_v50  ;;  %vm543_vm15 = vcmp.eq.s32.totalorder %v502_v44, %v1160_v12  ;;  %vm546_vm0 = vcmp.eq.s32.totalorder %v502_v44, %v1167_v22  ;;  %vm549_vm1 = vcmp.eq.s32.totalorder %v502_v44, %v1176_v38 }
  0xa3   :  { %v880_v42 = vsel %vm537_vm14, 1.0, %v1030_v45  ;;  %v889_v12 = vsel %vm546_vm0, 1.0, %v1030_v45 }
  0xc7   :  { %v364_v48 = vpop.f32.mrf.mxu0 }
  0xc9   :  { %v388_v51 = vpop.f32.mrf.mxu1 }
  0xca   :  { %v389_v52 = vadd.f32 %v388_v51, %v364_v48  ;;  %v890_v51 = vsel %vm547_vm10, 1.0, %v1030_v45 }
  0xcb   :  { %v412_v53 = vpop.f32.mrf.mxu2 }
  0xcc   :  { %v436_v55 = vpop.f32.mrf.mxu3  ;;  %v604_v56 = vsub.f32 %v389_v52, %v586_v49 }
  0xcd   :  { %v437_v57 = vadd.f32 %v436_v55, %v412_v53  ;;  %v891_v53 = vsel %vm548_vm11, 1.0, %v1030_v45 }
  0xce   :  { %622 = vst [vmem:[#allocation5] sm:$0xff] %v604_v56  ;;  %v602_v58 = vmul.f32 22.4, %v891_v53 }
  0xcf   :  { %v605_v59 = vsub.f32 %v437_v57, %v587_v54  ;;  %v366_v63 = vpop.f32.mrf.mxu0  ;;  %v601_v54 = vmul.f32 22.4, %v890_v51 }
  0xd1   :  { %623 = vst [vmem:[#allocation5 + $0x8] sm:$0xff] %v605_v59  ;;  %v390_v0 = vpop.f32.mrf.mxu1 }
  0xd2   :  { %v391_v1 = vadd.f32 %v390_v0, %v366_v63 }
  0xd3   :  { %v414_v3 = vpop.f32.mrf.mxu2 }
  0xd4   :  { %v438_v4 = vpop.f32.mrf.mxu3  ;;  %v607_v5 = vsub.f32 %v391_v1, %v589_v62  ;;  %v877_v1 = vsel %vm534_vm12, 1.0, %v1030_v45 }
  0xd5   :  { %v439_v6 = vadd.f32 %v438_v4, %v414_v3  ;;  %v883_v3 = vsel %vm540_vm13, 1.0, %v1030_v45 }
  0xd6   :  { %625 = vst [vmem:[#allocation5 + $0x18] sm:$0xff] %v607_v5 }
  0xd7   :  { %v608_v8 = vsub.f32 %v439_v6, %v590_v2  ;;  %v369_v10 = vpop.f32.mrf.mxu0  ;;  %v588_v2 = vmul.f32 22.4, %v877_v1 }
  0xd9   :  { %626 = vst [vmem:[#allocation5 + $0x20] sm:$0xff] %v608_v8  ;;  %v393_v13 = vpop.f32.mrf.mxu1  ;;  %v594_v8 = vmul.f32 22.4, %v883_v3 }
  0xda   :  { %v394_v14 = vadd.f32 %v393_v13, %v369_v10  ;;  %v886_v13 = vsel %vm543_vm15, 1.0, %v1030_v45 }
  0xdb   :  { %v417_v15 = vpop.f32.mrf.mxu2  ;;  %v597_v50 = vmul.f32 22.4, %v886_v13 }
  0xdc   :  { %v441_v17 = vpop.f32.mrf.mxu3  ;;  %v610_v18 = vsub.f32 %v394_v14, %v592_v11  ;;  %v591_v11 = vmul.f32 22.4, %v880_v42 }
  0xdd   :  { %v442_v19 = vadd.f32 %v441_v17, %v417_v15 }
  0xde   :  { %628 = vst [vmem:[#allocation5 + $0x30] sm:$0xff] %v610_v18 }
  0xdf   :  { %v611_v21 = vsub.f32 %v442_v19, %v593_v16  ;;  %v371_v25 = vpop.f32.mrf.mxu0 }
  0xe1   :  { %629 = vst [vmem:[#allocation5 + $0x38] sm:$0xff] %v611_v21  ;;  %v395_v26 = vpop.f32.mrf.mxu1 }
  0xe2   :  { %v396_v27 = vadd.f32 %v395_v26, %v371_v25 }
  0xe3   :  { %v419_v29 = vpop.f32.mrf.mxu2 }
  0xe4   :  { %v443_v30 = vpop.f32.mrf.mxu3  ;;  %v613_v31 = vsub.f32 %v396_v27, %v595_v24  ;;  %v600_v24 = vmul.f32 22.4, %v889_v12 }
  0xe5   :  { %v444_v32 = vadd.f32 %v443_v30, %v419_v29 }
  0xe6   :  { %631 = vst [vmem:[#allocation5 + $0x48] sm:$0xff] %v613_v31 }
  0xe7   :  { %v614_v34 = vsub.f32 %v444_v32, %v596_v28  ;;  %v374_v36 = vpop.f32.mrf.mxu0  ;;  %v892_v28 = vsel %vm549_vm1, 1.0, %v1030_v45 }
  0xe8   :  { %v603_v30 = vmul.f32 22.4, %v892_v28 }
  0xe9   :  { %632 = vst [vmem:[#allocation5 + $0x50] sm:$0xff] %v614_v34  ;;  %v398_v39 = vpop.f32.mrf.mxu1 }
  0xea   :  { %v399_v40 = vadd.f32 %v398_v39, %v374_v36 }
  0xeb   :  { %v422_v41 = vpop.f32.mrf.mxu2 }
  0xec   :  { %v446_v47 = vpop.f32.mrf.mxu3  ;;  %v616_v48 = vsub.f32 %v399_v40, %v598_v37 }
  0xed   :  { %v447_v49 = vadd.f32 %v446_v47, %v422_v41 }
  0xee   :  { %634 = vst [vmem:[#allocation5 + $0x60] sm:$0xff] %v616_v48 }
  0xef   :  { %v617_v52 = vsub.f32 %v447_v49, %v599_v46  ;;  %v376_v55 = vpop.f32.mrf.mxu0 }
  0xf1   :  { %635 = vst [vmem:[#allocation5 + $0x68] sm:$0xff] %v617_v52  ;;  %v400_v56 = vpop.f32.mrf.mxu1 }
  0xf2   :  { %v401_v57 = vadd.f32 %v400_v56, %v376_v55 }
  0xf3   :  { %v424_v59 = vpop.f32.mrf.mxu2 }
  0xf4   :  { %v448_v61 = vpop.f32.mrf.mxu3  ;;  %v619_v62 = vsub.f32 %v401_v57, %v601_v54 }
  0xf5   :  { %v449_v63 = vadd.f32 %v448_v61, %v424_v59 }
  0xf6   :  { %637 = vst [vmem:[#allocation5 + $0x78] sm:$0xff] %v619_v62 }
  0xf7   :  { %v620_v0 = vsub.f32 %v449_v63, %v602_v58 }
  0xf9   :  { %638 = vst [vmem:[#allocation5 + $0x80] sm:$0xff] %v620_v0 }
 0x107   :  { %v460_v4 = vpop.f32.mrf.mxu0  ;;  %v484_v5 = vpop.f32.mrf.mxu1 }
 0x108   :  { %v485_v6 = vadd.f32 %v484_v5, %v460_v4 }
 0x10a   :  { %v606_v9 = vsub.f32 %v485_v6, %v588_v2 }
 0x10b   :  { %v465_v7 = vpop.f32.mrf.mxu2 }
 0x10c   :  { %v489_v10 = vpop.f32.mrf.mxu3  ;;  %624 = vst [vmem:[#allocation5 + $0x10] sm:$0xff] %v606_v9 }
 0x10d   :  { %v490_v43 = vadd.f32 %v489_v10, %v465_v7 }
 0x10f   :  { %v612_v60 = vsub.f32 %v490_v43, %v594_v8  ;;  %v462_v14 = vpop.f32.mrf.mxu0  ;;  %v486_v15 = vpop.f32.mrf.mxu1 }
 0x110   :  { %v487_v16 = vadd.f32 %v486_v15, %v462_v14 }
 0x111   :  { %630 = vst [vmem:[#allocation5 + $0x40] sm:$0xff] %v612_v60 }
 0x112   :  { %v609_v18 = vsub.f32 %v487_v16, %v591_v11 }
 0x113   :  { %v467_v17 = vpop.f32.mrf.mxu2 }
 0x114   :  { %v491_v19 = vpop.f32.mrf.mxu3  ;;  %627 = vst [vmem:[#allocation5 + $0x28] sm:$0xff] %v609_v18 }
 0x115   :  { %v492_v20 = vadd.f32 %v491_v19, %v467_v17 }
 0x117   :  { %v615_v21 = vsub.f32 %v492_v20, %v597_v50 }
 0x119   :  { %633 = vst [vmem:[#allocation5 + $0x58] sm:$0xff] %v615_v21 }
 0x11b   :  { %v470_v23 = vpop.f32.mrf.mxu2 }
 0x11c   :  { %v494_v25 = vpop.f32.mrf.mxu3 }
 0x11d   :  { %v495_v26 = vadd.f32 %v494_v25, %v470_v23 }
 0x11f   :  { %v618_v27 = vsub.f32 %v495_v26, %v600_v24 }
 0x121   :  { %636 = vst [vmem:[#allocation5 + $0x70] sm:$0xff] %v618_v27 }
 0x123   :  { %v472_v29 = vpop.f32.mrf.mxu2 }
 0x124   :  { %v496_v22 = vpop.f32.mrf.mxu3 }
 0x125   :  { %v497_v31 = vadd.f32 %v496_v22, %v472_v29 }
 0x127   :  { %v621_v32 = vsub.f32 %v497_v31, %v603_v30 }
 0x129   :  { %639 = vst [vmem:[#allocation5 + $0x88] sm:$0xff] %v621_v32 }
 0x12a   :  { %652 = dma.vmem_to_hbm [thread:$0]  %s645_s25, 2304, %s647_s28, [#allocation4], %s1032_s29, %s1032_s29, %s1033_s30  }
 0x12b   :  { %1024 = dma.done.wait [#allocation4], 2304  }
 0x12c   :  { %1025 = vsyncadd [#allocation4], 4294964992 }
 0x12d   :  { %657 = vsyncpa [#allocation3], 1 }
 0x12e   :  { %658 = vsyncpa [#allocation4], 1 }

</bundles_post_ra>
